<compile_context>
chip_gen: v5e
topology: v5e:2x2
jax: 0.10.0
libtpu: 0.0.40
codegen_flags: <defaults>
</compile_context>

<pallas_src>
import jax
import jax.numpy as jnp
from jax.experimental import pallas as pl
from jax.experimental.pallas import tpu as pltpu


def attention_gate_kernel(g_ref, x_ref, wg_ref, bg_ref, wx_ref, bx_ref,
                          wpsi_ref, bpsi_ref, out_ref):
    # g_ref:   (1, F_g, T)      x_ref: (1, F_l, T)
    # wg_ref:  (F_int, F_g)     bg_ref: (F_int, 1)   (BN + conv bias folded)
    # wx_ref:  (F_int, F_l)     bx_ref: (F_int, 1)
    # wpsi_ref:(1, F_int)       bpsi_ref: (1, 1)
    # out_ref: (1, F_l, T)
    g = g_ref[0]                                   # (F_g, T)
    x = x_ref[0]                                   # (F_l, T)

    # W_g path: 1x1 conv + folded BN  -> (F_int, T)
    g1 = jnp.dot(wg_ref[...], g, preferred_element_type=jnp.float32) + bg_ref[...]
    # W_x path: 1x1 conv + folded BN  -> (F_int, T)
    x1 = jnp.dot(wx_ref[...], x, preferred_element_type=jnp.float32) + bx_ref[...]

    a = jnp.maximum(g1 + x1, 0.0)                  # ReLU, (F_int, T)

    # psi: 1x1 conv (F_int -> 1) + folded BN + sigmoid  -> (1, T)
    logit = jnp.dot(wpsi_ref[...], a, preferred_element_type=jnp.float32) + bpsi_ref[...]
    psi = 1.0 / (1.0 + jnp.exp(-logit))            # sigmoid (EUP), (1, T)

    # gate the skip connection: broadcast psi over the F_l sublanes
    out_ref[0] = (x * psi).astype(out_ref.dtype)


def _choose_hw_tile(hw):
    """Largest lane-dense tile (multiple of 128) that divides H*W."""
    for t in (4096, 2048, 1024, 512, 256, 128):
        if hw % t == 0:
            return t
    return hw  # fall back to the full extent (still a legal block)


def init_attention_gate_params(key, F_g, F_l, F_int):
    k = jax.random.split(key, 12)
    p = {}
    # 1x1 conv weights stored as (C_out, C_in) == PyTorch weight[:, :, 0, 0]
    p["wg"] = jax.random.normal(k[0], (F_int, F_g), jnp.float32) * (1.0 / F_g) ** 0.5
    p["bg"] = 0.1 * jax.random.normal(k[1], (F_int,), jnp.float32)
    p["wx"] = jax.random.normal(k[2], (F_int, F_l), jnp.float32) * (1.0 / F_l) ** 0.5
    p["bx"] = 0.1 * jax.random.normal(k[3], (F_int,), jnp.float32)
    p["wpsi"] = jax.random.normal(k[4], (1, F_int), jnp.float32) * (1.0 / F_int) ** 0.5
    p["bpsi"] = 0.1 * jax.random.normal(k[5], (1,), jnp.float32)
    # BatchNorm params / running stats (inference mode, deterministic, non-trivial)
    p["g_gamma"] = 1.0 + 0.1 * jax.random.normal(k[6], (F_int,), jnp.float32)
    p["g_beta"] = 0.1 * jax.random.normal(k[7], (F_int,), jnp.float32)
    p["g_rm"] = 0.1 * jax.random.normal(k[8], (F_int,), jnp.float32)
    p["g_rv"] = 1.0 + 0.1 * jax.random.uniform(k[9], (F_int,), jnp.float32)
    p["x_gamma"] = 1.0 + 0.1 * jax.random.normal(k[10], (F_int,), jnp.float32)
    p["x_beta"] = 0.1 * jax.random.normal(k[11], (F_int,), jnp.float32)
    p["x_rm"] = jnp.zeros((F_int,), jnp.float32)
    p["x_rv"] = jnp.ones((F_int,), jnp.float32)
    p["p_gamma"] = jnp.ones((1,), jnp.float32) * 1.1
    p["p_beta"] = jnp.ones((1,), jnp.float32) * 0.05
    p["p_rm"] = jnp.zeros((1,), jnp.float32)
    p["p_rv"] = jnp.ones((1,), jnp.float32)
    return p


def attention_gate_forward(g_nchw, x_nchw, params, eps=1e-5):
    N, F_l, H, W = x_nchw.shape
    Ng, F_g, Hg, Wg_sp = g_nchw.shape
    assert Ng == N
    F_int = params["wg"].shape[0]

    # Spatial-size mismatch: PyTorch bilinearly resizes g1 (post conv+BN) to
    # x1's size.  A 1x1 conv + affine BN commutes with bilinear interpolation
    # (weights sum to 1), so resizing g here is equivalent.
    if (Hg, Wg_sp) != (H, W):
        g_nchw = jax.image.resize(g_nchw, (N, F_g, H, W), method="bilinear")

    # Fold conv bias + inference-mode BatchNorm into the matmul weights/biases.
    s_g = params["g_gamma"] / jnp.sqrt(params["g_rv"] + eps)
    wg_eff = params["wg"] * s_g[:, None]                       # (F_int, F_g)
    bg_eff = ((params["bg"] - params["g_rm"]) * s_g + params["g_beta"]).reshape(F_int, 1)

    s_x = params["x_gamma"] / jnp.sqrt(params["x_rv"] + eps)
    wx_eff = params["wx"] * s_x[:, None]                       # (F_int, F_l)
    bx_eff = ((params["bx"] - params["x_rm"]) * s_x + params["x_beta"]).reshape(F_int, 1)

    s_p = params["p_gamma"] / jnp.sqrt(params["p_rv"] + eps)   # scalar (1,)
    wpsi_eff = params["wpsi"] * s_p[:, None]                   # (1, F_int)
    bpsi_eff = ((params["bpsi"] - params["p_rm"]) * s_p + params["p_beta"]).reshape(1, 1)

    # Flatten spatial dims (free reshape of contiguous NCHW) -> lane dim = H*W.
    HW = H * W
    g_flat = g_nchw.reshape(N, F_g, HW)
    x_flat = x_nchw.reshape(N, F_l, HW)
    T = _choose_hw_tile(HW)

    out_flat = pl.pallas_call(
        attention_gate_kernel,
        out_shape=jax.ShapeDtypeStruct((N, F_l, HW), jnp.float32),
        grid=(N, HW // T),
        in_specs=[
            pl.BlockSpec((1, F_g, T), lambda n, t: (n, 0, t)),
            pl.BlockSpec((1, F_l, T), lambda n, t: (n, 0, t)),
            pl.BlockSpec((F_int, F_g), lambda n, t: (0, 0)),
            pl.BlockSpec((F_int, 1), lambda n, t: (0, 0)),
            pl.BlockSpec((F_int, F_l), lambda n, t: (0, 0)),
            pl.BlockSpec((F_int, 1), lambda n, t: (0, 0)),
            pl.BlockSpec((1, F_int), lambda n, t: (0, 0)),
            pl.BlockSpec((1, 1), lambda n, t: (0, 0)),
        ],
        out_specs=pl.BlockSpec((1, F_l, T), lambda n, t: (n, 0, t)),
        compiler_params=pltpu.CompilerParams(
            dimension_semantics=("parallel", "parallel"),
            vmem_limit_bytes=32 * 1024 * 1024,
        ),
    )(g_flat, x_flat, wg_eff, bg_eff, wx_eff, bx_eff, wpsi_eff, bpsi_eff)

    return out_flat.reshape(N, F_l, H, W)


def attention_gate_ref(g, x, params, eps=1e-5):
    """Pure-JAX reference matching the PyTorch forward (inference-mode BN)."""
    def conv1x1_bn(inp, w, b, gamma, beta, rm, rv):
        z = jnp.einsum("oc,nchw->nohw", w, inp) + b[None, :, None, None]
        s = gamma / jnp.sqrt(rv + eps)
        return z * s[None, :, None, None] + (beta - rm * s)[None, :, None, None]

    g1 = conv1x1_bn(g, params["wg"], params["bg"],
                    params["g_gamma"], params["g_beta"], params["g_rm"], params["g_rv"])
    x1 = conv1x1_bn(x, params["wx"], params["bx"],
                    params["x_gamma"], params["x_beta"], params["x_rm"], params["x_rv"])
    a = jnp.maximum(g1 + x1, 0.0)
    z = conv1x1_bn(a, params["wpsi"], params["bpsi"],
                   params["p_gamma"], params["p_beta"], params["p_rm"], params["p_rv"])
    psi = jax.nn.sigmoid(z)
    return x * psi


if __name__ == "__main__":
    key = jax.random.PRNGKey(0)
    kg, kx, kp = jax.random.split(key, 3)

    N, F_g, F_l, F_int, H, W = 2, 8, 4, 16, 16, 16
    g = jax.random.normal(kg, (N, F_g, H, W), jnp.float32)
    x = jax.random.normal(kx, (N, F_l, H, W), jnp.float32)

    params = init_attention_gate_params(kp, F_g, F_l, F_int)

    y = attention_gate_forward(g, x, params)
    y = jax.block_until_ready(y)

    assert y.shape == (N, F_l, H, W), y.shape
    assert bool(jnp.all(jnp.isfinite(y)))
    # psi is in (0,1), so |out| <= |x|
    assert bool(jnp.all(jnp.abs(y) <= jnp.abs(x) + 1e-5))

    y_ref = attention_gate_ref(g, x, params)
    assert bool(jnp.allclose(y, y_ref, rtol=2e-2, atol=2e-2)), float(
        jnp.max(jnp.abs(y - y_ref)))

    print("KERNEL_OK")
</pallas_src>

<mosaic_0001>
module attributes {stable_mosaic.version = 11 : i64} {
  func.func @attention_gate_kernel(%arg0: i32, %arg1: i32, %arg2: memref<1x8x256xf32, #tpu.memory_space<vmem>>, %arg3: memref<1x4x256xf32, #tpu.memory_space<vmem>>, %arg4: memref<16x8xf32, #tpu.memory_space<vmem>>, %arg5: memref<16x1xf32, #tpu.memory_space<vmem>>, %arg6: memref<16x4xf32, #tpu.memory_space<vmem>>, %arg7: memref<16x1xf32, #tpu.memory_space<vmem>>, %arg8: memref<1x16xf32, #tpu.memory_space<vmem>>, %arg9: memref<1x1xf32, #tpu.memory_space<vmem>>, %arg10: memref<1x4x256xf32, #tpu.memory_space<vmem>>) attributes {dimension_semantics = [#tpu.dimension_semantics<parallel>, #tpu.dimension_semantics<parallel>], iteration_bounds = array<i64: 2, 1>, scalar_prefetch = 0 : i64, scratch_operands = 0 : i64, tpu.core_type = #tpu.core_type<tc>, window_params = [{transform_indices = @transform_0, window_bounds = array<i64: 1, 8, 256>}, {transform_indices = @transform_1, window_bounds = array<i64: 1, 4, 256>}, {pipeline_mode = #tpu.pipeline_mode<synchronous>, transform_indices = @transform_2, window_bounds = array<i64: 16, 8>}, {pipeline_mode = #tpu.pipeline_mode<synchronous>, transform_indices = @transform_3, window_bounds = array<i64: 16, 1>}, {pipeline_mode = #tpu.pipeline_mode<synchronous>, transform_indices = @transform_4, window_bounds = array<i64: 16, 4>}, {pipeline_mode = #tpu.pipeline_mode<synchronous>, transform_indices = @transform_5, window_bounds = array<i64: 16, 1>}, {pipeline_mode = #tpu.pipeline_mode<synchronous>, transform_indices = @transform_6, window_bounds = array<i64: 1, 16>}, {pipeline_mode = #tpu.pipeline_mode<synchronous>, transform_indices = @transform_7, window_bounds = array<i64: 1, 1>}, {transform_indices = @transform_8, window_bounds = array<i64: 1, 4, 256>}]} {
    %c0 = arith.constant 0 : index
    %c0_0 = arith.constant 0 : index
    %c0_1 = arith.constant 0 : index
    %0 = vector.load %arg2[%c0, %c0_0, %c0_1] : memref<1x8x256xf32, #tpu.memory_space<vmem>>, vector<1x8x256xf32>
    %1 = vector.shape_cast %0 : vector<1x8x256xf32> to vector<8x256xf32>
    %c0_2 = arith.constant 0 : index
    %c0_3 = arith.constant 0 : index
    %c0_4 = arith.constant 0 : index
    %2 = vector.load %arg3[%c0_2, %c0_3, %c0_4] : memref<1x4x256xf32, #tpu.memory_space<vmem>>, vector<1x4x256xf32>
    %3 = vector.shape_cast %2 : vector<1x4x256xf32> to vector<4x256xf32>
    %c0_5 = arith.constant 0 : index
    %c0_6 = arith.constant 0 : index
    %4 = vector.load %arg4[%c0_5, %c0_6] : memref<16x8xf32, #tpu.memory_space<vmem>>, vector<16x8xf32>
    %cst = arith.constant dense<0.000000e+00> : vector<16x256xf32>
    %5 = tpu.matmul %4, %1, %cst {dimension_numbers = #tpu.dot_dimension_numbers<[1], [0], [0], [1], [0, 0, 1, 1], [], []>} : vector<16x8xf32>, vector<8x256xf32>, vector<16x256xf32> -> vector<16x256xf32>
    %c0_7 = arith.constant 0 : index
    %c0_8 = arith.constant 0 : index
    %6 = vector.load %arg5[%c0_7, %c0_8] : memref<16x1xf32, #tpu.memory_space<vmem>>, vector<16x1xf32>
    %7 = vector.broadcast %6 : vector<16x1xf32> to vector<16x256xf32>
    %8 = arith.addf %5, %7 : vector<16x256xf32>
    %c0_9 = arith.constant 0 : index
    %c0_10 = arith.constant 0 : index
    %9 = vector.load %arg6[%c0_9, %c0_10] : memref<16x4xf32, #tpu.memory_space<vmem>>, vector<16x4xf32>
    %cst_11 = arith.constant dense<0.000000e+00> : vector<16x256xf32>
    %10 = tpu.matmul %9, %3, %cst_11 {dimension_numbers = #tpu.dot_dimension_numbers<[1], [0], [0], [1], [0, 0, 1, 1], [], []>} : vector<16x4xf32>, vector<4x256xf32>, vector<16x256xf32> -> vector<16x256xf32>
    %c0_12 = arith.constant 0 : index
    %c0_13 = arith.constant 0 : index
    %11 = vector.load %arg7[%c0_12, %c0_13] : memref<16x1xf32, #tpu.memory_space<vmem>>, vector<16x1xf32>
    %12 = vector.broadcast %11 : vector<16x1xf32> to vector<16x256xf32>
    %13 = arith.addf %10, %12 : vector<16x256xf32>
    %14 = arith.addf %8, %13 : vector<16x256xf32>
    %cst_14 = arith.constant 0.000000e+00 : f32
    %15 = vector.broadcast %cst_14 : f32 to vector<16x256xf32>
    %16 = arith.maximumf %14, %15 : vector<16x256xf32>
    %c0_15 = arith.constant 0 : index
    %c0_16 = arith.constant 0 : index
    %17 = vector.load %arg8[%c0_15, %c0_16] : memref<1x16xf32, #tpu.memory_space<vmem>>, vector<1x16xf32>
    %cst_17 = arith.constant dense<0.000000e+00> : vector<1x256xf32>
    %18 = tpu.matmul %17, %16, %cst_17 {dimension_numbers = #tpu.dot_dimension_numbers<[1], [0], [0], [1], [0, 0, 1, 1], [], []>} : vector<1x16xf32>, vector<16x256xf32>, vector<1x256xf32> -> vector<1x256xf32>
    %c0_18 = arith.constant 0 : index
    %c0_19 = arith.constant 0 : index
    %19 = vector.load %arg9[%c0_18, %c0_19] : memref<1x1xf32, #tpu.memory_space<vmem>>, vector<1x1xf32>
    %20 = vector.broadcast %19 : vector<1x1xf32> to vector<1x256xf32>
    %21 = arith.addf %18, %20 : vector<1x256xf32>
    %cst_20 = arith.constant 0.000000e+00 : f32
    %22 = vector.broadcast %cst_20 : f32 to vector<1x256xf32>
    %23 = arith.subf %22, %21 : vector<1x256xf32>
    %24 = math.exp %23 : vector<1x256xf32>
    %cst_21 = arith.constant 1.000000e+00 : f32
    %25 = vector.broadcast %cst_21 : f32 to vector<1x256xf32>
    %26 = arith.addf %25, %24 : vector<1x256xf32>
    %cst_22 = arith.constant 1.000000e+00 : f32
    %27 = vector.broadcast %cst_22 : f32 to vector<1x256xf32>
    %28 = arith.divf %27, %26 : vector<1x256xf32>
    %29 = vector.broadcast %28 : vector<1x256xf32> to vector<4x256xf32>
    %30 = arith.mulf %3, %29 : vector<4x256xf32>
    %c0_23 = arith.constant 0 : index
    %c0_24 = arith.constant 0 : index
    %c0_25 = arith.constant 0 : index
    %31 = vector.load %arg10[%c0_23, %c0_24, %c0_25] : memref<1x4x256xf32, #tpu.memory_space<vmem>>, vector<1x4x256xf32>
    %32 = vector.shape_cast %31 : vector<1x4x256xf32> to vector<4x256xf32>
    %33 = vector.shape_cast %30 : vector<4x256xf32> to vector<1x4x256xf32>
    tpu.vector_store %arg10[%c0_23, %c0_24, %c0_25], %33 {strides = array<i32>} : memref<1x4x256xf32, #tpu.memory_space<vmem>>, vector<1x4x256xf32>,
    return
  }
  func.func @transform_0(%arg0: i32, %arg1: i32) -> (i32, i32, i32) {
    %c0_i32 = arith.constant 0 : i32
    %c0_i32_0 = arith.constant 0 : i32
    return %arg0, %c0_i32, %arg1 : i32, i32, i32
  }
  func.func @transform_1(%arg0: i32, %arg1: i32) -> (i32, i32, i32) {
    %c0_i32 = arith.constant 0 : i32
    %c0_i32_0 = arith.constant 0 : i32
    return %arg0, %c0_i32, %arg1 : i32, i32, i32
  }
  func.func @transform_2(%arg0: i32, %arg1: i32) -> (i32, i32) {
    %c0_i32 = arith.constant 0 : i32
    %c0_i32_0 = arith.constant 0 : i32
    %c0_i32_1 = arith.constant 0 : i32
    return %c0_i32, %c0_i32_0 : i32, i32
  }
  func.func @transform_3(%arg0: i32, %arg1: i32) -> (i32, i32) {
    %c0_i32 = arith.constant 0 : i32
    %c0_i32_0 = arith.constant 0 : i32
    %c0_i32_1 = arith.constant 0 : i32
    return %c0_i32, %c0_i32_0 : i32, i32
  }
  func.func @transform_4(%arg0: i32, %arg1: i32) -> (i32, i32) {
    %c0_i32 = arith.constant 0 : i32
    %c0_i32_0 = arith.constant 0 : i32
    %c0_i32_1 = arith.constant 0 : i32
    return %c0_i32, %c0_i32_0 : i32, i32
  }
  func.func @transform_5(%arg0: i32, %arg1: i32) -> (i32, i32) {
    %c0_i32 = arith.constant 0 : i32
    %c0_i32_0 = arith.constant 0 : i32
    %c0_i32_1 = arith.constant 0 : i32
    return %c0_i32, %c0_i32_0 : i32, i32
  }
  func.func @transform_6(%arg0: i32, %arg1: i32) -> (i32, i32) {
    %c0_i32 = arith.constant 0 : i32
    %c0_i32_0 = arith.constant 0 : i32
    %c0_i32_1 = arith.constant 0 : i32
    return %c0_i32, %c0_i32_0 : i32, i32
  }
  func.func @transform_7(%arg0: i32, %arg1: i32) -> (i32, i32) {
    %c0_i32 = arith.constant 0 : i32
    %c0_i32_0 = arith.constant 0 : i32
    %c0_i32_1 = arith.constant 0 : i32
    return %c0_i32, %c0_i32_0 : i32, i32
  }
  func.func @transform_8(%arg0: i32, %arg1: i32) -> (i32, i32, i32) {
    %c0_i32 = arith.constant 0 : i32
    %c0_i32_0 = arith.constant 0 : i32
    return %arg0, %c0_i32, %arg1 : i32, i32, i32
  }
}

</mosaic_0001>

<bundles_post_ra>
// kernel: tpu_custom_call.1
= control target key start
LH: loop header
LB: loop body
LE: loop exit
PB: predicated region body
PF: predicated region fallthrough
CT: control target
= control target key end

     0   :  { %s1107_s0 = inlined_call_operand.vmem [shape: f32[2,8,256], index: 0, kind: input, shape index: {}]   ;;  %s1108_s1 = inlined_call_operand.vmem [shape: f32[2,4,256], index: 1, kind: input, shape index: {}]   ;;  %s1109_s2 = inlined_call_operand.vmem [shape: f32[16,8], index: 2, kind: input, shape index: {}]   ;;  %s1110_s3 = inlined_call_operand.vmem [shape: f32[16,1], index: 3, kind: input, shape index: {}]   ;;  %s1111_s4 = inlined_call_operand.vmem [shape: f32[16,4], index: 4, kind: input, shape index: {}]   ;;  %s1112_s5 = inlined_call_operand.vmem [shape: f32[16,1], index: 5, kind: input, shape index: {}]   ;;  %s1113_s6 = inlined_call_operand.vmem [shape: f32[1,16], index: 6, kind: input, shape index: {}]   ;;  %s1114_s7 = inlined_call_operand.<no memory space> [shape: f32[1,1], index: 7, kind: input, shape index: {}]   ;;  %s1115_s8 = inlined_call_operand.hbm [shape: f32[2,4,256], index: 8, kind: output, shape index: {}]  }
   0x1   :  { %v13_v0 = vstv %s1114_s7 }
   0x2   :  { %14 = vst [vmem:[#allocation2] sm:$0x1] %v13_v0 }
   0x3   :  { %15 = vsyncpa [#allocation4], 0 }
   0x4   :  { %17 = vsyncpa [#allocation4 + $0x1], 0  ;;  %s965_s29 = smov 0   ;;  %s967_s30 = smov 0  }
   0x5   :  { %s969_s9 = smov 0   ;;  %s971_s10 = smov 0  }
   0x6   :  { %s973_s11 = smov 0   ;;  %s975_s12 = smov 0  }
   0x7 LB: > { %s739_s7 = sadd.s32 4294967295, %s914_s12   ;;  %s740_s13 = sadd.s32 4294967294, %s914_s12   ;;  %s914_s12 = sphi %s975_s12, %s23_s12   ;;  %s910_s11 = sphi %s973_s11, %s1122_s11   ;;  %s906_s10 = sphi %s971_s10, %s1121_s10   ;;  %s902_s9 = sphi %s969_s9, %s1120_s9   ;;  %s898_s30 = sphi %s967_s30, %s1119_s30   ;;  %s894_s29 = sphi %s965_s29, %s1118_s29  }
   0x8   : > { %s35_s14 = sadd.s32 1, %s910_s11  ;;  %s226_s15 = sadd.s32 1, %s902_s9 }
   0x9   : > { %p37_p0 = scmp.ge.s32.totalorder %s35_s14, 2  ;;  %p236_p1 = scmp.ne.s32.totalorder %s902_s9, %s898_s30 }
   0xa   : > { %p237_p2 = scmp.eq.s32.totalorder %s739_s7, 1  ;;  %p242_p3 = scmp.ne.s32.totalorder %s898_s30, %s894_s29 }
   0xb   : > { %s1124_s14 = smov (%p37_p0, %s35_s14), 0  ;;  %p243_p5 = scmp.eq.s32.totalorder %s740_s13, 1 }
   0xc   : > { %p1005_p4 = por %p237_p2, %p236_p1  ;;  %s221_s17 = ssub.s32 %s910_s11, %s1124_s14 }
   0xd   : > { %p743_p6 = scmp.ge.s32.totalorder %s914_s12, 1  ;;  %p224_p7 = scmp.eq.s32.totalorder %s221_s17, 0 }
   0xe   : > { %p1012_p8 = por %p243_p5, %p242_p3  ;;  %p305_p9 = scmp.lt.s32.totalorder %s914_s12, 3 }
   0xf   : > { %s1018_s19 = scalar_select %p224_p7, %s902_s9, %s226_s15  }
  0x10   : > { %p306_p10 = pnand %p743_p6, %p305_p9 }
  0x11   : > { %p353_p11 = scmp.lt.s32.totalorder (!%p306_p10), %s906_s10, 1  ;;  %s349_s21 = sand.u32 (!%p306_p10), 1, %s898_s30  }
  0x12   : > { %309 = sbr.rel (%p306_p10) target bundleno = 356 (0x164), region = 52  ;;  %s768_s23 = sshll.u32 (!%p306_p10), %s906_s10, 3 }
  0x17   : > { %v379_v1 = vld [vmem:[%s1110_s3 + $0x8] sm:$0xff]  ;;  %s354_s22 = scalar_select %p353_p11, %s906_s10, 1  ;;  %v916_v2 = vmov 0   ;;  %v378_v3 = vld [vmem:[%s1110_s3] sm:$0xff]  ;;  %vm390_vm0 = vcmask 64512   ;;  %vm468_vm1 = vcmask 1043456  }
  0x18   : > { %826 = vset.pattern.permute.xlu1 %v916_v2  ;;  %825 = vset.pattern.permute.xlu0 %v916_v2  ;;  %v376_v4 = vld [vmem:[%s1109_s2] sm:$0xff]  ;;  %v446_v8 = vld [vmem:[%s1112_s5 + $0x8] sm:$0xff]  ;;  %vm461_vm2 = vcmask 31744   ;;  %vm535_vm3 = vcmask 130048  }
  0x19   : > { %387 = vperm.xlu0 %825, %v379_v1   ;;  %382 = vperm.xlu1 %826, %v378_v3   ;;  %s766_s25 = sshll.u32 %s354_s22, 4  ;;  %s767_s26 = sshll.u32 %s354_s22, 3  ;;  %v445_v9 = vld [vmem:[%s1112_s5] sm:$0xff]  ;;  %v377_v11 = vld [vmem:[%s1109_s2 + $0x8] sm:$0xff] }
  0x1a   : > { %827 = vset.pattern.permute.xlu2 %v916_v2  ;;  %s360_s7 = scalar_lea.vmem %s1107_s0, %s766_s25  ;;  %s370_s17 = scalar_lea.vmem %s1108_s1, %s767_s26  ;;  %v443_v10 = vld [vmem:[%s1111_s4] sm:$0xff]  ;;  %v444_v14 = vld [vmem:[%s1111_s4 + $0x8] sm:$0xff] }
  0x1b   : > { %v373_v5 = vld [vmem:[%s360_s7] sm:$0xff]  ;;  %v374_v7 = vld [vmem:[%s360_s7 + $0x8] sm:$0xff]  ;;  %s744_s22 = sshll.u32 %s349_s21, 3  ;;  %s640_s26 = scalar_lea.hbm %s1115_s8, %s768_s23 }
  0x1c   : > { %v1037_v6 = vld [vmem:[%s370_s17] sm:$0xff]  ;;  %412 = vmatpush.msra.mxu0 %v373_v5  ;;  %435 = vmatpush.msra.mxu1 %v374_v7  ;;  %v528_v15 = vld [vmem:[#allocation2] sm:$0x1]  ;;  %s351_s27 = scalar_lea.vmem [#allocation3], %s744_s22  ;;  %s644_s28 = sshll.u32 %s640_s26, 4  ;;  %s645_s28 = int_to_ptr.hbm [resolvable:$true] %s644_s28 }
  0x1d   : > { %458 = vst [vmem:[#allocation1] ss:$2 sm:$0xff] %v1037_v6  ;;  %749 = vmatmul.msk.f32.vlgmr.msra.gmra.mxu0 %vm390_vm0, %v376_v4  ;;  %751 = vmatmul.msk.f32.vlgmr.msra.gmra.mxu1 %vm390_vm0, %v376_v4  ;;  %v527_v44 = vld [vmem:[%s1113_s6] sm:$0x1]  ;;  %s642_s10 = sshll.u32 %s351_s27, 4  ;;  %s627_s7 = scalar_lea.sflag [#allocation4], %s349_s21  ;;  %s643_s10 = int_to_ptr.vmem [resolvable:$true] %s642_s10 }
  0x1e   : > { %531 = vperm.xlu2 %827, %v528_v15   ;;  %s850_s13 = sshra.s32 %s645_s28, 4  ;;  %s856_s22 = scalar_lea.hbm %s1115_s8, 16  ;;  %s851_s13 = int_to_ptr.hbm [resolvable:$true] %s850_s13 }
  0x1f   : > { %s852_s15 = scalar_lea.hbm %s851_s13, 8  ;;  %p857_p1 = scmp.lt.s32.totalorder %s851_s13, %s1115_s8 }
  0x20   : > { %p853_p12 = scmp.ne.s32.totalorder %s851_s13, %s852_s15  ;;  %p858_p2 = scmp.lt.s32.totalorder %s856_s22, %s852_s15 }
  0x21   : > { %454 = vperm.xlu0 %825, %v446_v8   ;;  %449 = vperm.xlu1 %826, %v445_v9  }
  0x22   : > { %p854_p13 = pnand %p853_p12, %p1005_p4  ;;  %p859_p3 = por %p858_p2, %p857_p1 }
  0x24   : > { %v459_v12 = vld.sshfl [vmem:[#allocation1] sm:$0xff pattern:$0x75316420]  ;;  %v460_v13 = vld.sshfl [vmem:[#allocation1 + $0x8] sm:$0xff pattern:$0x75316420]  ;;  %p855_p0 = pneg %p854_p13 }
  0x25   : > { %753 = vmatpush.msk.msra.mxu2 %vm468_vm1, %v459_v12  ;;  %756 = vmatpush.msk.msra.mxu3 %vm468_vm1, %v460_v13 }
  0x26   : > { %754 = vmatmul.msk.f32.vlgmr.msra.gmra.mxu2 %vm461_vm2, %v443_v10  ;;  %757 = vmatmul.msk.f32.vlgmr.msra.gmra.mxu3 %vm461_vm2, %v443_v10  ;;  %p860_p5 = pnand %p859_p3, %p855_p0 }
  0x27   : > { %750 = vmatmul.msk.f32.gmra.mxu0 %vm390_vm0, %v377_v11  ;;  %752 = vmatmul.msk.f32.gmra.mxu1 %vm390_vm0, %v377_v11 }
  0x2e   : > { %755 = vmatmul.msk.f32.gmra.mxu2 %vm461_vm2, %v444_v14  ;;  %758 = vmatmul.msk.f32.gmra.mxu3 %vm461_vm2, %v444_v14 }
  0x78   : > { %v532_v45 = vpop.permute.xlu2 %531 }
  0x79   : > { %v534_v46 = vperm.slane %v532_v45, 0 }
  0x8b   : > { %v383_v16 = vpop.permute.xlu1 %382  ;;  %v388_v19 = vpop.permute.xlu0 %387 }
  0x93   : > { %v450_v22 = vpop.permute.xlu1 %449  ;;  %v455_v27 = vpop.permute.xlu0 %454 }
  0x9a   : > { %v414_v17 = vpop.f32.mrf.mxu0  ;;  %v437_v18 = vpop.f32.mrf.mxu1 }
  0x9b   : > { %v415_v25 = vadd.f32 %v414_v17, %v383_v16  ;;  %v438_v26 = vadd.f32 %v437_v18, %v383_v16 }
  0xa4   : > { %v417_v23 = vpop.f32.mrf.mxu0  ;;  %v440_v24 = vpop.f32.mrf.mxu1 }
  0xa5   : > { %v418_v32 = vadd.f32 %v417_v23, %v388_v19  ;;  %v441_v33 = vadd.f32 %v440_v24, %v388_v19 }
  0xa9   : > { %v490_v20 = vpop.f32.mrf.mxu2  ;;  %v513_v21 = vpop.f32.mrf.mxu3 }
  0xaa   : > { %v491_v28 = vadd.f32 %v490_v20, %v450_v22  ;;  %v514_v29 = vadd.f32 %v513_v21, %v450_v22 }
  0xac   : > { %v519_v38 = vadd.f32 %v491_v28, %v415_v25  ;;  %v520_v39 = vadd.f32 %v514_v29, %v438_v26 }
  0xae   : > { %v523_v42 = vmax.f32 %v519_v38, 0.0  ;;  %v524_v43 = vmax.f32 %v520_v39, 0.0 }
  0xb1   : > { %v493_v30 = vpop.f32.mrf.mxu2  ;;  %v516_v31 = vpop.f32.mrf.mxu3 }
  0xb2   : > { %v494_v34 = vadd.f32 %v493_v30, %v455_v27  ;;  %v517_v35 = vadd.f32 %v516_v31, %v455_v27 }
  0xb4   : > { %v521_v36 = vadd.f32 %v494_v34, %v418_v32  ;;  %v522_v37 = vadd.f32 %v517_v35, %v441_v33 }
  0xb6   : > { %v525_v40 = vmax.f32 %v521_v36, 0.0  ;;  %v526_v41 = vmax.f32 %v522_v37, 0.0 }
  0xb8   : > { %553 = vmatpush.msrb.mxu0 %v525_v40  ;;  %573 = vmatpush.msrb.mxu1 %v526_v41 }
  0xba   : > { %554 = vmatpush.msrb.mxu0 %v523_v42  ;;  %574 = vmatpush.msrb.mxu1 %v524_v43 }
  0xbb   : > { %759 = vmatmul.msk.f32.vlgmr.msrb.gmra.mxu0 %vm535_vm3, %v527_v44  ;;  %760 = vmatmul.msk.f32.vlgmr.msrb.gmra.mxu1 %vm535_vm3, %v527_v44 }
 0x138   : > { %v556_v47 = vpop.f32.mrf.mxu0  ;;  %v576_v48 = vpop.f32.mrf.mxu1 }
 0x139   : > { %v557_v49 = vadd.f32 %v556_v47, %v534_v46  ;;  %v577_v50 = vadd.f32 %v576_v48, %v534_v46 }
 0x13b   : > { %v579_v51 = vsub.f32 0.0, %v557_v49  ;;  %v580_v52 = vsub.f32 0.0, %v577_v50 }
 0x13d   : > { %v581_v53 = vmul.f32 1.442695, %v579_v51  ;;  %v583_v54 = vmul.f32 1.442695, %v580_v52 }
 0x13f   : > { %828 = vpow2.f32 %v581_v53 }
 0x140   : > { %830 = vpow2.f32 %v583_v54 }
 0x145   : > { %v829_v55 = vpop.eup %828 }
 0x146   : > { %v831_v56 = vpop.eup %830  ;;  %v585_v57 = vadd.f32 1.0, %v829_v55 }
 0x147   : > { %v586_v58 = vadd.f32 1.0, %v831_v56 }
 0x148   : > { %832 = vrcp.f32 %v585_v57  ;;  %v598_v3 = vand.u32 2147483648, %v585_v57  ;;  %v596_v5 = vand.u32 2147483647, %v585_v57  ;;  %vm592_vm6 = vweird.f32 %v585_v57 }
 0x149   : > { %834 = vrcp.f32 %v586_v58  ;;  %v613_v2 = vand.u32 2147483648, %v586_v58  ;;  %v611_v7 = vand.u32 2147483647, %v586_v58  ;;  %vm607_vm7 = vweird.f32 %v586_v58 }
 0x14a   : > { %v599_v11 = vor.u32 1.1754944e-38, %v598_v3  ;;  %vm597_vm10 = vcmp.eq.f32.partialorder %v596_v5, 8.507059e+37 }
 0x14b   : > { %v614_v12 = vor.u32 1.1754944e-38, %v613_v2  ;;  %vm612_vm11 = vcmp.eq.f32.partialorder %v611_v7, 8.507059e+37 }
 0x14e   : > { %v833_v59 = vpop.eup %832 }
 0x14f   : > { %v835_v60 = vpop.eup %834  ;;  %v588_v61 = vmul.f32 %v833_v59, %v585_v57  ;;  %vm593_vm4 = vweird.f32 %v833_v59 }
 0x150   : > { %v603_v62 = vmul.f32 %v835_v60, %v586_v58  ;;  %vm608_vm5 = vweird.f32 %v835_v60  ;;  %vm594_vm8 = vmor %vm592_vm6, %vm593_vm4 }
 0x151   : > { %v589_v63 = vsub.f32 1.0, %v588_v61  ;;  %vm609_vm9 = vmor %vm607_vm7, %vm608_vm5 }
 0x152   : > { %v604_v0 = vsub.f32 1.0, %v603_v62 }
 0x153   : > { %v590_v1 = vmul.f32 %v833_v59, %v589_v63 }
 0x154   : > { %v605_v4 = vmul.f32 %v835_v60, %v604_v0 }
 0x155   : > { %v591_v8 = vadd.f32 %v833_v59, %v590_v1 }
 0x156   : > { %v606_v9 = vadd.f32 %v835_v60, %v605_v4 }
 0x157   : > { %v595_v10 = vsel %vm594_vm8, %v833_v59, %v591_v8 }
 0x158   : > { %v610_v13 = vsel %vm609_vm9, %v835_v60, %v606_v9  ;;  %v600_v14 = vsel %vm597_vm10, %v599_v11, %v595_v10 }
 0x159   : > { %v615_v15 = vsel %vm612_vm11, %v614_v12, %v610_v13  ;;  %v617_v17 = vperm.slane %v600_v14, 0 }
 0x15a   : > { %v618_v16 = vperm.slane %v615_v15, 0 }
 0x15c   : > { %v621_v18 = vrot.slane %v618_v16, 4 }
 0x15e   : > { %v622_v19 = vsel %vm468_vm1, %v617_v17, %v621_v18 }
 0x15f   : > { %v624_v20 = vmul.f32 %v622_v19, %v1037_v6 }
 0x161   : > { %625 = vst [vmem:[%s351_s27] sm:$0xff] %v624_v20 }
 0x162   : > { %863 = shalt.err (!%p860_p5)
}
 0x163   : > { %769 = dma.vmem_to_hbm [thread:$0]  (%p1005_p4), %s643_s10, 128, %s645_s28, %s627_s7  }
 0x164 PF: > { %p775_p6 = scmp.ge.s32.totalorder %s914_s12, 2  ;;  %s656_s21 = sand.u32 1, %s894_s29  }
 0x165   : > { %s657_s25 = scalar_lea.sflag [#allocation4], %s656_s21 }
 0x166   : > { %p772_p7 = pnand %p775_p6, %p1012_p8 }
 0x168   : > { %p773_p9 = pneg %p772_p7 }
 0x16a   : > { %889 = dma.done.wait (%p773_p9), %s657_s25, 128  }
 0x16b   : > { %891 = vsyncadd (%p773_p9), %s657_s25, 4294967168  ;;  %s23_s12 = sadd.s32 1, %s914_s12   ;;  %s1118_s29 = smov %s898_s30 }
 0x16c   : > { %p20_p10 = scmp.ge.s32.totalorder %s23_s12, 4   ;;  %s1119_s30 = smov %s902_s9 }
 0x16d   : > { %s1120_s9 = smov %s1018_s19  ;;  %s1121_s10 = smov %s910_s11 }
 0x16e   : > { %s1122_s11 = smov %s1124_s14  ;;  %22 = sbr.rel (!%p20_p10) target bundleno = 7 (0x7), region = 90 }
 0x173   :  { %663 = vsyncpa [#allocation4], 1 }
 0x174   :  { %665 = vsyncpa [#allocation4 + $0x1], 1 }

</bundles_post_ra>
